<compile_context>
chip_gen: v7x
topology: tpu7x:2x2x1
jax: 0.10.0
libtpu: 0.0.40
codegen_flags: <defaults>
</compile_context>

<pallas_src>
import functools

import jax
import jax.numpy as jnp
from jax import lax
from jax.experimental import pallas as pl
from jax.experimental.pallas import tpu as pltpu

LN_EPS = 1e-5  # PyTorch nn.LayerNorm default

_TARGET_BLOCK_BYTES = 2 * 1024 * 1024  # ~2 MiB per activation block


def _posenc_layernorm_kernel(x_ref, pos_ref, gamma_ref, beta_ref, o_ref):
    # x_ref:    (BN, TL, D)  activation block
    # pos_ref:  (TL, D)      positional embeddings for this L-tile (VMEM resident per tile)
    # gamma_ref:(1, D)       LayerNorm weight (resident across grid)
    # beta_ref: (1, D)       LayerNorm bias   (resident across grid)
    x = x_ref[...].astype(jnp.float32)
    pos = pos_ref[...].astype(jnp.float32)

    h = x + pos[None, :, :]                                   # (BN, TL, D)

    # Two independent cross-lane reductions (E[h] and E[h^2]) in f32.
    mean = jnp.mean(h, axis=-1, keepdims=True)                # (BN, TL, 1)
    mean_sq = jnp.mean(h * h, axis=-1, keepdims=True)         # (BN, TL, 1)
    var = jnp.maximum(mean_sq - mean * mean, 0.0)             # biased var (torch LN)
    inv = lax.rsqrt(var + LN_EPS)

    g = gamma_ref[...].astype(jnp.float32)                    # (1, D)
    b = beta_ref[...].astype(jnp.float32)                     # (1, D)
    y = (h - mean) * inv * g[None, :, :] + b[None, :, :]

    # TODO(synk): train-mode dropout (would use pltpu.prng_seed / prng_random_bits);
    # here dropout is eval-mode identity.
    o_ref[...] = y.astype(o_ref.dtype)


def _choose_tiles(N, L, D, itemsize, target_bytes=_TARGET_BLOCK_BYTES):
    """Pick (BN, TL) so one activation block is ~target_bytes and sublane-aligned."""
    # sublane packing: 8 rows for 4-byte, 16 for 2-byte, 32 for 1-byte dtypes
    sub = 8 if itemsize >= 4 else (16 if itemsize == 2 else 32)
    rows_target = max(1, target_bytes // max(1, D * itemsize))
    if L <= rows_target:
        tl = L                                   # full L fits; block equals full dim
    else:
        tl = max(sub, (min(rows_target, L) // sub) * sub)  # multiple of sublane count
    # If a single L-tile is still small, pack several batch elements per step.
    bn = int(max(1, min(N, rows_target // max(1, tl))))
    return bn, tl


@functools.partial(jax.jit, static_argnames=())
def trainable_positional_encoding(input_feat, pos_table, ln_gamma, ln_beta):
    """input_feat: (N, L, D); pos_table: (max_pos, D); ln_gamma/ln_beta: (D,)."""
    N, L, D = input_feat.shape
    max_pos = pos_table.shape[0]
    assert L <= max_pos, (
        f"sequence length {L} exceeds max_position_embeddings {max_pos}")

    bn, tl = _choose_tiles(N, L, D, input_feat.dtype.itemsize)

    gamma2d = ln_gamma.reshape(1, D)
    beta2d = ln_beta.reshape(1, D)

    grid = (pl.cdiv(N, bn), pl.cdiv(L, tl))

    return pl.pallas_call(
        _posenc_layernorm_kernel,
        out_shape=jax.ShapeDtypeStruct((N, L, D), input_feat.dtype),
        grid_spec=pltpu.PrefetchScalarGridSpec(
            num_scalar_prefetch=0,
            grid=grid,
            in_specs=[
                # activation block: (BN, TL, D)
                pl.BlockSpec((bn, tl, D), lambda b, l: (b, l, 0)),
                # positional table windowed directly (no wrapper slice): (TL, D)
                pl.BlockSpec((tl, D), lambda b, l: (l, 0)),
                # LayerNorm params, constant index -> VMEM resident across grid
                pl.BlockSpec((1, D), lambda b, l: (0, 0)),
                pl.BlockSpec((1, D), lambda b, l: (0, 0)),
            ],
            out_specs=pl.BlockSpec((bn, tl, D), lambda b, l: (b, l, 0)),
        ),
        compiler_params=pltpu.CompilerParams(
            # N-tiles and L-tiles are independent -> both parallel (v7x megacore).
            dimension_semantics=("parallel", "parallel"),
            # 32 MiB scoped VMEM is safe on v5e/v6e/v7x and comfortably holds the
            # double-buffered ~2 MiB input/output/pos blocks.
            vmem_limit_bytes=32 * 1024 * 1024,
        ),
    )(input_feat, pos_table, gamma2d, beta2d)


def _reference(input_feat, pos_table, ln_gamma, ln_beta):
    N, L, D = input_feat.shape
    h = input_feat.astype(jnp.float32) + pos_table[:L][None, :, :].astype(jnp.float32)
    mean = jnp.mean(h, axis=-1, keepdims=True)
    var = jnp.mean((h - mean) ** 2, axis=-1, keepdims=True)
    y = (h - mean) / jnp.sqrt(var + LN_EPS)
    return y * ln_gamma + ln_beta


if __name__ == "__main__":
    key = jax.random.PRNGKey(0)
    k_x, k_pos = jax.random.split(key)

    # Small shapes consistent with forward: (N, L, D)
    N, L, D = 2, 8, 32
    max_position_embeddings = 16
    hidden_size = D

    # Deterministic parameter init (shapes from __init__):
    #   nn.Embedding(max_pos, hidden) weight ~ N(0, 1)
    #   nn.LayerNorm(hidden): weight = 1, bias = 0
    pos_table = jax.random.normal(k_pos, (max_position_embeddings, hidden_size),
                                  dtype=jnp.float32)
    ln_gamma = jnp.ones((hidden_size,), dtype=jnp.float32)
    ln_beta = jnp.zeros((hidden_size,), dtype=jnp.float32)

    input_feat = jax.random.normal(k_x, (N, L, D), dtype=jnp.float32)

    out = trainable_positional_encoding(input_feat, pos_table, ln_gamma, ln_beta)
    out = jax.block_until_ready(out)

    ref = _reference(input_feat, pos_table, ln_gamma, ln_beta)
    assert out.shape == (N, L, D)
    assert jnp.allclose(out, ref, atol=2e-5, rtol=2e-5)

    print("KERNEL_OK")
</pallas_src>

<mosaic_0001>
module attributes {stable_mosaic.version = 11 : i64} {
  func.func @_posenc_layernorm_kernel(%arg0: i32, %arg1: i32, %arg2: memref<2x8x32xf32, #tpu.memory_space<vmem>>, %arg3: memref<8x32xf32, #tpu.memory_space<vmem>>, %arg4: memref<1x32xf32, #tpu.memory_space<vmem>>, %arg5: memref<1x32xf32, #tpu.memory_space<vmem>>, %arg6: memref<2x8x32xf32, #tpu.memory_space<vmem>>) attributes {dimension_semantics = [#tpu.dimension_semantics<parallel>, #tpu.dimension_semantics<parallel>], iteration_bounds = array<i64: 1, 1>, scalar_prefetch = 0 : i64, scratch_operands = 0 : i64, tpu.core_type = #tpu.core_type<tc>, window_params = [{transform_indices = @transform_0, window_bounds = array<i64: 2, 8, 32>}, {transform_indices = @transform_1, window_bounds = array<i64: 8, 32>}, {pipeline_mode = #tpu.pipeline_mode<synchronous>, transform_indices = @transform_2, window_bounds = array<i64: 1, 32>}, {pipeline_mode = #tpu.pipeline_mode<synchronous>, transform_indices = @transform_3, window_bounds = array<i64: 1, 32>}, {transform_indices = @transform_4, window_bounds = array<i64: 2, 8, 32>}]} {
    %c0 = arith.constant 0 : index
    %c0_0 = arith.constant 0 : index
    %c0_1 = arith.constant 0 : index
    %0 = vector.load %arg2[%c0, %c0_0, %c0_1] : memref<2x8x32xf32, #tpu.memory_space<vmem>>, vector<2x8x32xf32>
    %c0_2 = arith.constant 0 : index
    %c0_3 = arith.constant 0 : index
    %1 = vector.load %arg3[%c0_2, %c0_3] : memref<8x32xf32, #tpu.memory_space<vmem>>, vector<8x32xf32>
    %2 = vector.shape_cast %1 : vector<8x32xf32> to vector<1x8x32xf32>
    %3 = vector.broadcast %2 : vector<1x8x32xf32> to vector<2x8x32xf32>
    %4 = arith.addf %0, %3 : vector<2x8x32xf32>
    %cst = arith.constant dense<0.000000e+00> : vector<2x8xf32>
    %5 = vector.multi_reduction <add>, %4, %cst [2] : vector<2x8x32xf32> to vector<2x8xf32>
    %6 = vector.shape_cast %5 : vector<2x8xf32> to vector<2x8x1xf32>
    %cst_4 = arith.constant 3.200000e+01 : f32
    %7 = vector.broadcast %cst_4 : f32 to vector<2x8x1xf32>
    %8 = arith.divf %6, %7 : vector<2x8x1xf32>
    %9 = arith.mulf %4, %4 : vector<2x8x32xf32>
    %cst_5 = arith.constant dense<0.000000e+00> : vector<2x8xf32>
    %10 = vector.multi_reduction <add>, %9, %cst_5 [2] : vector<2x8x32xf32> to vector<2x8xf32>
    %11 = vector.shape_cast %10 : vector<2x8xf32> to vector<2x8x1xf32>
    %cst_6 = arith.constant 3.200000e+01 : f32
    %12 = vector.broadcast %cst_6 : f32 to vector<2x8x1xf32>
    %13 = arith.divf %11, %12 : vector<2x8x1xf32>
    %14 = arith.mulf %8, %8 : vector<2x8x1xf32>
    %15 = arith.subf %13, %14 : vector<2x8x1xf32>
    %cst_7 = arith.constant 0.000000e+00 : f32
    %16 = vector.broadcast %cst_7 : f32 to vector<2x8x1xf32>
    %17 = arith.maximumf %15, %16 : vector<2x8x1xf32>
    %cst_8 = arith.constant 9.99999974E-6 : f32
    %18 = vector.broadcast %cst_8 : f32 to vector<2x8x1xf32>
    %19 = arith.addf %17, %18 : vector<2x8x1xf32>
    %20 = math.rsqrt %19 : vector<2x8x1xf32>
    %c0_9 = arith.constant 0 : index
    %c0_10 = arith.constant 0 : index
    %21 = vector.load %arg4[%c0_9, %c0_10] : memref<1x32xf32, #tpu.memory_space<vmem>>, vector<1x32xf32>
    %c0_11 = arith.constant 0 : index
    %c0_12 = arith.constant 0 : index
    %22 = vector.load %arg5[%c0_11, %c0_12] : memref<1x32xf32, #tpu.memory_space<vmem>>, vector<1x32xf32>
    %23 = vector.broadcast %8 : vector<2x8x1xf32> to vector<2x8x32xf32>
    %24 = arith.subf %4, %23 : vector<2x8x32xf32>
    %25 = vector.broadcast %20 : vector<2x8x1xf32> to vector<2x8x32xf32>
    %26 = arith.mulf %24, %25 : vector<2x8x32xf32>
    %27 = vector.shape_cast %21 : vector<1x32xf32> to vector<1x1x32xf32>
    %28 = vector.broadcast %27 : vector<1x1x32xf32> to vector<2x8x32xf32>
    %29 = arith.mulf %26, %28 : vector<2x8x32xf32>
    %30 = vector.shape_cast %22 : vector<1x32xf32> to vector<1x1x32xf32>
    %31 = vector.broadcast %30 : vector<1x1x32xf32> to vector<2x8x32xf32>
    %32 = arith.addf %29, %31 : vector<2x8x32xf32>
    %c0_13 = arith.constant 0 : index
    %c0_14 = arith.constant 0 : index
    %c0_15 = arith.constant 0 : index
    %33 = vector.load %arg6[%c0_13, %c0_14, %c0_15] : memref<2x8x32xf32, #tpu.memory_space<vmem>>, vector<2x8x32xf32>
    tpu.vector_store %arg6[%c0_13, %c0_14, %c0_15], %32 {strides = array<i32>} : memref<2x8x32xf32, #tpu.memory_space<vmem>>, vector<2x8x32xf32>,
    return
  }
  func.func @transform_0(%arg0: i32, %arg1: i32) -> (i32, i32, i32) {
    %c0_i32 = arith.constant 0 : i32
    %c0_i32_0 = arith.constant 0 : i32
    return %arg0, %arg1, %c0_i32 : i32, i32, i32
  }
  func.func @transform_1(%arg0: i32, %arg1: i32) -> (i32, i32) {
    %c0_i32 = arith.constant 0 : i32
    %c0_i32_0 = arith.constant 0 : i32
    return %arg1, %c0_i32 : i32, i32
  }
  func.func @transform_2(%arg0: i32, %arg1: i32) -> (i32, i32) {
    %c0_i32 = arith.constant 0 : i32
    %c0_i32_0 = arith.constant 0 : i32
    %c0_i32_1 = arith.constant 0 : i32
    return %c0_i32, %c0_i32_0 : i32, i32
  }
  func.func @transform_3(%arg0: i32, %arg1: i32) -> (i32, i32) {
    %c0_i32 = arith.constant 0 : i32
    %c0_i32_0 = arith.constant 0 : i32
    %c0_i32_1 = arith.constant 0 : i32
    return %c0_i32, %c0_i32_0 : i32, i32
  }
  func.func @transform_4(%arg0: i32, %arg1: i32) -> (i32, i32, i32) {
    %c0_i32 = arith.constant 0 : i32
    %c0_i32_0 = arith.constant 0 : i32
    return %arg0, %arg1, %c0_i32 : i32, i32, i32
  }
}

</mosaic_0001>

<bundles_post_ra>
// kernel: trainable_positional_encoding.1
= control target key start
LH: loop header
LB: loop body
LE: loop exit
PB: predicated region body
PF: predicated region fallthrough
CT: control target
= control target key end

     0   :  { %9 = vsyncpa [#allocation3], 0  ;;  %s291_s0 = inlined_call_operand.hbm [shape: f32[2,8,32], index: 0, kind: input, shape index: {}]   ;;  %s292_s1 = inlined_call_operand.hbm [shape: f32[16,32], index: 1, kind: input, shape index: {}]   ;;  %s293_s2 = inlined_call_operand.vmem [shape: f32[1,32], index: 2, kind: input, shape index: {}]   ;;  %s294_s3 = inlined_call_operand.vmem [shape: f32[1,32], index: 3, kind: input, shape index: {}]   ;;  %s295_s4 = inlined_call_operand.hbm [shape: f32[2,8,32], index: 4, kind: output, shape index: {}]  }
   0x1   :  { %10 = vsyncpa [#allocation6], 0 }
   0x2   :  { %11 = vsyncpa [#allocation4], 0  ;;  %s204_s15 = smov [#allocation2]   ;;  %s132_s19 = scalar_lea.hbm %s291_s0, 256 }
   0x3   :  { %s17_s16 = sshll.u32 %s204_s15, 4  ;;  %p133_p0 = scmp.ne.s32.totalorder %s291_s0, %s132_s19  ;;  %s18_s16 = int_to_ptr.vmem [resolvable:$true] %s17_s16 }
   0x4   :  { %p136_p1 = scmp.lt.u32.totalorder %s132_s19, %s291_s0 }
   0x6   :  { %p138_p2 = pnand %p136_p1, %p133_p0 }
   0x8   :  { %141 = shalt.err (!%p138_p2)
}
   0x9   :  { %s142_s24 = scalar_lea.vmem %s18_s16, 256  ;;  %p147_p4 = scmp.lt.s32.totalorder %s18_s16, %s18_s16 }
   0xa   :  { %p143_p3 = scmp.ne.s32.totalorder %s18_s16, %s142_s24  ;;  %p148_p5 = scmp.lt.s32.totalorder %s142_s24, %s142_s24 }
   0xc   :  { %p149_p6 = por %p148_p5, %p147_p4 }
   0xe   :  { %p150_p7 = pnand %p149_p6, %p143_p3 }
  0x10   :  { %153 = shalt.err (!%p150_p7)
}
  0x11   :  { %s205_s25 = smov 128   ;;  %s206_s26 = smov 8  }
  0x12   :  { %23 = dma.hbm_to_vmem [thread:$0]  %s291_s0, 256, %s18_s16, [#allocation3], %s205_s25, %s205_s25, %s206_s26  }
  0x13   :  { %s207_s29 = smov [#allocation5]   ;;  %s154_s7 = scalar_lea.hbm %s292_s1, 128 }
  0x14   :  { %s30_s30 = sshll.u32 %s207_s29, 4  ;;  %p155_p8 = scmp.ne.s32.totalorder %s292_s1, %s154_s7  ;;  %s31_s30 = int_to_ptr.vmem [resolvable:$true] %s30_s30 }
  0x15   :  { %s156_s12 = scalar_lea.hbm %s292_s1, 256  ;;  %p158_p10 = scmp.lt.u32.totalorder %s154_s7, %s292_s1 }
  0x16   :  { %p157_p9 = scmp.lt.u32.totalorder %s156_s12, %s154_s7 }
  0x18   :  { %p159_p11 = por %p158_p10, %p157_p9 }
  0x1a   :  { %p160_p12 = pnand %p159_p11, %p155_p8 }
  0x1c   :  { %163 = shalt.err (!%p160_p12)
}
  0x1d   :  { %s164_s0 = scalar_lea.vmem %s31_s30, 128  ;;  %p169_p0 = scmp.lt.s32.totalorder %s31_s30, %s31_s30 }
  0x1e   :  { %p165_p13 = scmp.ne.s32.totalorder %s31_s30, %s164_s0  ;;  %p170_p1 = scmp.lt.s32.totalorder %s164_s0, %s164_s0 }
  0x20   :  { %p171_p2 = por %p170_p1, %p169_p0 }
  0x22   :  { %p172_p3 = pnand %p171_p2, %p165_p13 }
  0x24   :  { %175 = shalt.err (!%p172_p3)
}
  0x25   :  { %33 = dma.hbm_to_vmem [thread:$0]  %s292_s1, 128, %s31_s30, [#allocation6]  }
  0x26   :  { %198 = dma.done.wait [#allocation3], 256  }
  0x27   :  { %199 = vsyncadd [#allocation3], 4294967040 }
  0x28   :  { %200 = dma.done.wait [#allocation6], 128  }
  0x29   :  { %201 = vsyncadd [#allocation6], 4294967168  ;;  %v44_v0 = vld [vmem:[#allocation2] sm:$0xff]  ;;  %v46_v1 = vld [vmem:[#allocation5] sm:$0xff]  ;;  %vm49_vm0 = vcmask 261120   ;;  %s208_s20 = smov [#allocation7]  }
  0x2a   :  { %v45_v2 = vld [vmem:[#allocation2 + $0x8] sm:$0xff]  ;;  %v47_v3 = vadd.f32 %v46_v1, %v44_v0  ;;  %v121_v29 = vld [vmem:[%s293_s2] ss:$0 sm:$0xff]  ;;  %s108_s21 = sshll.u32 %s208_s20, 4  ;;  %s109_s21 = int_to_ptr.vmem [resolvable:$true] %s108_s21 }
  0x2b   :  { %v48_v4 = vadd.f32 %v46_v1, %v45_v2  ;;  %v122_v31 = vld [vmem:[%s294_s3] ss:$0 sm:$0xff]  ;;  %s176_s2 = scalar_lea.vmem %s109_s21, 256  ;;  %p181_p5 = scmp.lt.s32.totalorder %s109_s21, %s109_s21 }
  0x2c   :  { %v50_v5 = vsel %vm49_vm0, %v47_v3, 0.0  ;;  %v59_v6 = vmul.f32 %v47_v3, %v47_v3  ;;  %p177_p4 = scmp.ne.s32.totalorder %s109_s21, %s176_s2  ;;  %p182_p6 = scmp.lt.s32.totalorder %s176_s2, %s176_s2 }
  0x2d   :  { %v60_v7 = vmul.f32 %v48_v4, %v48_v4  ;;  %51 = vadd.xlane.f32.xlu0 %v50_v5  ;;  %v53_v9 = vsel %vm49_vm0, %v48_v4, 0.0 }
  0x2e   :  { %v61_v8 = vsel %vm49_vm0, %v59_v6, 0.0  ;;  %p183_p7 = por %p182_p6, %p181_p5 }
  0x2f   :  { %62 = vadd.xlane.f32.xlu1 %v61_v8  ;;  %v64_v10 = vsel %vm49_vm0, %v60_v7, 0.0 }
  0x30   :  { %p184_p8 = pnand %p183_p7, %p177_p4 }
  0x31   :  { %54 = vadd.xlane.f32.xlu0 %v53_v9 }
  0x33   :  { %65 = vadd.xlane.f32.xlu1 %v64_v10 }
  0xba   :  { %v52_v11 = vpop.xlane.xlu0 %51 }
  0xbb   :  { %v57_v12 = vmul.f32 0.03125, %v52_v11 }
  0xbc   :  { %v63_v13 = vpop.xlane.xlu1 %62 }
  0xbd   :  { %v69_v14 = vmul.f32 %v57_v12, %v57_v12  ;;  %v67_v15 = vmul.f32 0.03125, %v63_v13  ;;  %v81_v27 = vsub.f32 %v47_v3, %v57_v12 }
  0xbe   :  { %v55_v16 = vpop.xlane.xlu0 %54 }
  0xbf   :  { %v71_v17 = vsub.f32 %v67_v15, %v69_v14  ;;  %v58_v18 = vmul.f32 0.03125, %v55_v16 }
  0xc0   :  { %v66_v19 = vpop.xlane.xlu1 %65 }
  0xc1   :  { %v73_v20 = vmax.f32 %v71_v17, 0.0  ;;  %v70_v21 = vmul.f32 %v58_v18, %v58_v18  ;;  %v68_v22 = vmul.f32 0.03125, %v66_v19  ;;  %v82_v32 = vsub.f32 %v48_v4, %v58_v18 }
  0xc3   :  { %v75_v23 = vadd.f32 1e-05, %v73_v20  ;;  %v72_v24 = vsub.f32 %v68_v22, %v70_v21 }
  0xc5   :  { %128 = vrsqrt.f32 %v75_v23  ;;  %v74_v25 = vmax.f32 %v72_v24, 0.0 }
  0xc7   :  { %v76_v26 = vadd.f32 1e-05, %v74_v25 }
  0xc9   :  { %130 = vrsqrt.f32 %v76_v26 }
  0xcf   :  { %v129_v28 = vpop.eup %128 }
  0xd0   :  { %v83_v30 = vmul.f32 %v129_v28, %v81_v27 }
  0xd2   :  { %v91_v33 = vmul.f32 %v121_v29, %v83_v30 }
  0xd3   :  { %v131_v34 = vpop.eup %130 }
  0xd4   :  { %v84_v35 = vmul.f32 %v131_v34, %v82_v32  ;;  %v99_v36 = vadd.f32 %v122_v31, %v91_v33 }
  0xd6   :  { %v92_v37 = vmul.f32 %v121_v29, %v84_v35  ;;  %101 = vst.msk [vmem:[#allocation7] sm:$0xff] %vm49_vm0, %v99_v36 }
  0xd8   :  { %v100_v38 = vadd.f32 %v122_v31, %v92_v37 }
  0xda   :  { %102 = vst.msk [vmem:[#allocation7 + $0x8] sm:$0xff] %vm49_vm0, %v100_v38 }
  0xdb   :  { %187 = shalt.err (!%p184_p8)
}
  0xdc   :  { %s188_s23 = scalar_lea.hbm %s295_s4, 256 }
  0xdd   :  { %p189_p9 = scmp.ne.s32.totalorder %s295_s4, %s188_s23  ;;  %p192_p10 = scmp.lt.u32.totalorder %s188_s23, %s295_s4 }
  0xdf   :  { %p194_p11 = pnand %p192_p10, %p189_p9 }
  0xe1   :  { %197 = shalt.err (!%p194_p11)
}
  0xe2   :  { %114 = dma.vmem_to_hbm [thread:$0]  %s109_s21, 256, %s295_s4, [#allocation4], %s205_s25, %s205_s25, %s206_s26  }
  0xe3   :  { %202 = dma.done.wait [#allocation4], 256  }
  0xe4   :  { %203 = vsyncadd [#allocation4], 4294967040 }
  0xe5   :  { %118 = vsyncpa [#allocation3], 1 }
  0xe6   :  { %119 = vsyncpa [#allocation6], 1 }
  0xe7   :  { %120 = vsyncpa [#allocation4], 1 }

</bundles_post_ra>
